<compile_context>
chip_gen: v7x
topology: tpu7x:2x2x1
jax: 0.10.0
libtpu: 0.0.40
codegen_flags: <defaults>
</compile_context>

<pallas_src>
import jax
import jax.numpy as jnp
import numpy as np
from jax.experimental import pallas as pl
from jax.experimental.pallas import tpu as pltpu


def make_kernel(TB, Lout_pad, fs_max, NF_pad):
    def kernel(emb_ref, w_ref, b_ref, vlen_ref, wfc_ref, bfc_ref, out_ref):
        # --- im2col: TB samples -> one [TB*Lout_pad, fs_max*E] bf16 slab --------------
        slabs = []
        for b in range(TB):                                   # static unroll
            eb = emb_ref[b]                                   # [Lp, E] bf16
            slabs.append(jnp.concatenate(
                [eb[j:j + Lout_pad, :] for j in range(fs_max)], axis=1))
        x2 = jnp.concatenate(slabs, axis=0)                   # [TB*Lout_pad, K] bf16

        # --- ONE MXU matmul covering every sample and every filter size ---------------
        conv = jnp.dot(x2, w_ref[...],
                       preferred_element_type=jnp.float32)    # [TB*Lout_pad, NF_pad] f32

        # --- validity mask computed in-kernel: row < per-column pooled length ---------
        # (covers per-filter valid conv length, the odd row dropped by MaxPool2d((2,1)),
        #  the 8-row alignment padding, and the zero-padded lanes beyond n*F).
        row = jax.lax.broadcasted_iota(jnp.int32, (Lout_pad, NF_pad), 0)
        valid = row < vlen_ref[...]                           # [Lout_pad, NF_pad] bool

        # --- per-sample global max over valid rows, then bias + ReLU ------------------
        # Pool BEFORE bias/ReLU (exact: max commutes with +bias, ReLU monotone).
        pooled_rows = []
        for b in range(TB):                                   # tile-aligned static slices
            cb = conv[b * Lout_pad:(b + 1) * Lout_pad, :]
            pooled_rows.append(jnp.max(jnp.where(valid, cb, -jnp.inf),
                                       axis=0, keepdims=True))
        pooled = jnp.concatenate(pooled_rows, axis=0)         # [TB, NF_pad] f32
        pooled = jnp.maximum(pooled + b_ref[...], 0.0)

        # TODO(synk): nn.Dropout is identity in eval mode; train-time masking not implemented.
        out = jnp.dot(pooled.astype(jnp.bfloat16), wfc_ref[...],
                      preferred_element_type=jnp.float32) + bfc_ref[...]   # [TB, O_pad]
        out_ref[...] = out.astype(out_ref.dtype)

    return kernel


def cnn_forward(emb, conv_params, fc_w, fc_b, filter_sizes, tb=8):
    """emb: [B, L, E] f32; conv_params: list of (w [fs,E,F], b [1,F]);
    fc_w: [F*n, O]; fc_b: [1, O]. Returns [B, O] f32."""
    B, L, E = emb.shape
    F = conv_params[0][0].shape[-1]
    O = fc_w.shape[-1]
    n = len(filter_sizes)
    fs_min, fs_max = min(filter_sizes), max(filter_sizes)

    for fs in filter_sizes:
        if L - fs + 1 < 2:  # PyTorch MaxPool2d((2,1)) would error on an empty window
            raise ValueError(f"sequence length {L} too short for filter size {fs}")

    Lout_max = L - fs_min + 1
    Lout_pad = ((Lout_max + 7) // 8) * 8     # sublane-aligned per-sample window count
    Lp = Lout_pad + fs_max - 1               # padded length so every window is in-bounds
    K = fs_max * E
    nF = n * F
    NF_pad = ((nF + 127) // 128) * 128       # lane-dense conv output / FC K width
    O_pad = ((O + 127) // 128) * 128         # lane-dense FC output, sliced back outside
    TB = tb
    # NOTE: TB=8 -> M = TB*Lout_pad = 128 rows/conv matmul (fills a v5e MXU pass);
    # use TB=16 (M=256) to fill the 2x256^2 MXU on v6e/v7x once batches are larger.
    B_pad = ((B + TB - 1) // TB) * TB

    # Embeddings: pad batch + length with zeros, stream as bf16 (matmul runs bf16 anyway).
    emb_p = jnp.pad(emb, ((0, B_pad - B), (0, Lp - L), (0, 0))).astype(jnp.bfloat16)

    # Stack conv weights: [fs, E, F] -> [fs*E, F], zero-pad K to fs_max*E, concat along N,
    # then zero-pad N to 128 lanes.
    w_blocks, b_blocks = [], []
    for (w, b), fs in zip(conv_params, filter_sizes):
        wk = w.reshape(fs * E, F)
        wk = jnp.pad(wk, ((0, (fs_max - fs) * E), (0, 0)))
        w_blocks.append(wk)
        b_blocks.append(b)
    w_all = jnp.pad(jnp.concatenate(w_blocks, axis=1),
                    ((0, 0), (0, NF_pad - nF))).astype(jnp.bfloat16)      # [K, NF_pad]
    bias_all = jnp.pad(jnp.concatenate(b_blocks, axis=1),
                       ((0, 0), (0, NF_pad - nF))).astype(jnp.float32)    # [1, NF_pad]

    # Per-column pooled length: rows [0, lpool) are valid for filter fs,
    # lpool = 2*floor((L-fs+1)/2) (Conv2d valid length then MaxPool2d((2,1)) row drop).
    # Zero-padded lanes get 0 -> fully masked -> relu(-inf + 0) = 0 -> zero FC rows.
    vlen_np = np.zeros((1, NF_pad), np.int32)
    for idx, fs in enumerate(filter_sizes):
        vlen_np[0, idx * F:(idx + 1) * F] = ((L - fs + 1) // 2) * 2
    vlen = jnp.asarray(vlen_np)

    # FC weights padded to lane-dense K (=NF_pad) and N (=O_pad).
    wfc = jnp.pad(fc_w, ((0, NF_pad - nF), (0, O_pad - O))).astype(jnp.bfloat16)
    bfc = jnp.pad(fc_b, ((0, 0), (0, O_pad - O))).astype(jnp.float32)

    kernel = make_kernel(TB, Lout_pad, fs_max, NF_pad)
    out = pl.pallas_call(
        kernel,
        out_shape=jax.ShapeDtypeStruct((B_pad, O_pad), jnp.float32),
        grid_spec=pltpu.PrefetchScalarGridSpec(
            num_scalar_prefetch=0,
            grid=(B_pad // TB,),
            in_specs=[
                pl.BlockSpec((TB, Lp, E), lambda i: (i, 0, 0)),       # TB samples' emb (bf16)
                pl.BlockSpec((K, NF_pad), lambda i: (0, 0)),          # stacked conv W
                pl.BlockSpec((1, NF_pad), lambda i: (0, 0)),          # conv biases
                pl.BlockSpec((1, NF_pad), lambda i: (0, 0)),          # per-column pooled length
                pl.BlockSpec((NF_pad, O_pad), lambda i: (0, 0)),      # FC weight
                pl.BlockSpec((1, O_pad), lambda i: (0, 0)),           # FC bias
            ],
            out_specs=pl.BlockSpec((TB, O_pad), lambda i: (i, 0)),    # lane-dense full-vreg store
        ),
        compiler_params=pltpu.CompilerParams(
            dimension_semantics=("parallel",)),
    )(emb_p, w_all, bias_all, vlen, wfc, bfc)
    return out[:B, :O]


def ref_forward(emb, conv_params, fc_w, fc_b, filter_sizes):
    """Pure-JAX f32 reference mirroring the PyTorch forward (eval mode)."""
    B, L, E = emb.shape
    pooled = []
    for (w, b), fs in zip(conv_params, filter_sizes):
        Lout = L - fs + 1
        acc = jnp.zeros((B, Lout, w.shape[-1]), jnp.float32)
        for i in range(fs):
            acc = acc + jnp.einsum('ble,ef->blf', emb[:, i:i + Lout, :], w[i])
        acc = jax.nn.relu(acc + b[0][None, None, :])
        Lpool = (Lout // 2) * 2                  # MaxPool2d((2,1)) drops the odd last row
        pooled.append(jnp.max(acc[:, :Lpool, :], axis=1))
    cat = jnp.concatenate(pooled, axis=1)
    return cat @ fc_w + fc_b[0][None, :]


if __name__ == "__main__":
    # Small, deterministic configuration consistent with the module's __init__.
    vocab_size = 50
    embedding_dim = 16          # E
    num_filters = 8             # F
    filter_sizes = (2, 3, 4)
    output_dim = 4              # O
    padding_idx = 0
    B, L = 2, 12                # batch, sequence length

    key = jax.random.PRNGKey(0)
    k_emb, k_x, k_fc_w, k_fc_b, *k_convs = jax.random.split(key, 4 + 2 * len(filter_sizes))

    # Embedding table (padding_idx row zeroed, matching nn.Embedding(padding_idx=0)).
    emb_table = jax.random.normal(k_emb, (vocab_size, embedding_dim), jnp.float32)
    emb_table = emb_table.at[padding_idx].set(0.0)

    # Conv weights: PyTorch Conv2d weight [F, 1, fs, E] stored here as [fs, E, F].
    conv_params = []
    for i, fs in enumerate(filter_sizes):
        kw, kb = k_convs[2 * i], k_convs[2 * i + 1]
        w = 0.1 * jax.random.normal(kw, (fs, embedding_dim, num_filters), jnp.float32)
        b = 0.1 * jax.random.normal(kb, (1, num_filters), jnp.float32)
        conv_params.append((w, b))

    # FC: PyTorch Linear weight [O, F*n] stored transposed as [F*n, O].
    fc_w = 0.1 * jax.random.normal(
        k_fc_w, (num_filters * len(filter_sizes), output_dim), jnp.float32)
    fc_b = 0.1 * jax.random.normal(k_fc_b, (1, output_dim), jnp.float32)

    # Token ids + embedding lookup (glue; gather stays in plain JAX).
    x = jax.random.randint(k_x, (B, L), 0, vocab_size, dtype=jnp.int32)
    emb = emb_table[x]                                   # [B, L, E]

    out = cnn_forward(emb, conv_params, fc_w, fc_b, filter_sizes, tb=8)
    out = jax.block_until_ready(out)

    ref = ref_forward(emb, conv_params, fc_w, fc_b, filter_sizes)
    np.testing.assert_allclose(np.asarray(out), np.asarray(ref), rtol=2e-2, atol=2e-2)

    print("KERNEL_OK")
</pallas_src>

<mosaic_0001>
module attributes {stable_mosaic.version = 11 : i64} {
  func.func @kernel(%arg0: i32, %arg1: memref<8x19x16xbf16, #tpu.memory_space<vmem>>, %arg2: memref<64x128xbf16, #tpu.memory_space<vmem>>, %arg3: memref<1x128xf32, #tpu.memory_space<vmem>>, %arg4: memref<1x128xi32, #tpu.memory_space<vmem>>, %arg5: memref<128x128xbf16, #tpu.memory_space<vmem>>, %arg6: memref<1x128xf32, #tpu.memory_space<vmem>>, %arg7: memref<8x128xf32, #tpu.memory_space<vmem>>) attributes {dimension_semantics = [#tpu.dimension_semantics<parallel>], iteration_bounds = array<i64: 1>, scalar_prefetch = 0 : i64, scratch_operands = 0 : i64, tpu.core_type = #tpu.core_type<tc>, window_params = [{transform_indices = @transform_0, window_bounds = array<i64: 8, 19, 16>}, {pipeline_mode = #tpu.pipeline_mode<synchronous>, transform_indices = @transform_1, window_bounds = array<i64: 64, 128>}, {pipeline_mode = #tpu.pipeline_mode<synchronous>, transform_indices = @transform_2, window_bounds = array<i64: 1, 128>}, {pipeline_mode = #tpu.pipeline_mode<synchronous>, transform_indices = @transform_3, window_bounds = array<i64: 1, 128>}, {pipeline_mode = #tpu.pipeline_mode<synchronous>, transform_indices = @transform_4, window_bounds = array<i64: 128, 128>}, {pipeline_mode = #tpu.pipeline_mode<synchronous>, transform_indices = @transform_5, window_bounds = array<i64: 1, 128>}, {transform_indices = @transform_6, window_bounds = array<i64: 8, 128>}]} {
    %c0 = arith.constant 0 : index
    %c0_0 = arith.constant 0 : index
    %c0_1 = arith.constant 0 : index
    %0 = vector.load %arg1[%c0, %c0_0, %c0_1] : memref<8x19x16xbf16, #tpu.memory_space<vmem>>, vector<1x19x16xbf16>
    %1 = vector.shape_cast %0 : vector<1x19x16xbf16> to vector<19x16xbf16>
    %2 = vector.extract_strided_slice %1 {offsets = [0, 0], sizes = [16, 16], strides = [1, 1]} : vector<19x16xbf16> to vector<16x16xbf16>
    %3 = vector.extract_strided_slice %1 {offsets = [1, 0], sizes = [16, 16], strides = [1, 1]} : vector<19x16xbf16> to vector<16x16xbf16>
    %4 = vector.extract_strided_slice %1 {offsets = [2, 0], sizes = [16, 16], strides = [1, 1]} : vector<19x16xbf16> to vector<16x16xbf16>
    %5 = vector.extract_strided_slice %1 {offsets = [3, 0], sizes = [16, 16], strides = [1, 1]} : vector<19x16xbf16> to vector<16x16xbf16>
    %6 = tpu.concatenate %2, %3, %4, %5 in 1 : vector<16x16xbf16>, vector<16x16xbf16>, vector<16x16xbf16>, vector<16x16xbf16> -> vector<16x64xbf16>
    %c1 = arith.constant 1 : index
    %c0_2 = arith.constant 0 : index
    %c0_3 = arith.constant 0 : index
    %7 = vector.load %arg1[%c1, %c0_2, %c0_3] : memref<8x19x16xbf16, #tpu.memory_space<vmem>>, vector<1x19x16xbf16>
    %8 = vector.shape_cast %7 : vector<1x19x16xbf16> to vector<19x16xbf16>
    %9 = vector.extract_strided_slice %8 {offsets = [0, 0], sizes = [16, 16], strides = [1, 1]} : vector<19x16xbf16> to vector<16x16xbf16>
    %10 = vector.extract_strided_slice %8 {offsets = [1, 0], sizes = [16, 16], strides = [1, 1]} : vector<19x16xbf16> to vector<16x16xbf16>
    %11 = vector.extract_strided_slice %8 {offsets = [2, 0], sizes = [16, 16], strides = [1, 1]} : vector<19x16xbf16> to vector<16x16xbf16>
    %12 = vector.extract_strided_slice %8 {offsets = [3, 0], sizes = [16, 16], strides = [1, 1]} : vector<19x16xbf16> to vector<16x16xbf16>
    %13 = tpu.concatenate %9, %10, %11, %12 in 1 : vector<16x16xbf16>, vector<16x16xbf16>, vector<16x16xbf16>, vector<16x16xbf16> -> vector<16x64xbf16>
    %c2 = arith.constant 2 : index
    %c0_4 = arith.constant 0 : index
    %c0_5 = arith.constant 0 : index
    %14 = vector.load %arg1[%c2, %c0_4, %c0_5] : memref<8x19x16xbf16, #tpu.memory_space<vmem>>, vector<1x19x16xbf16>
    %15 = vector.shape_cast %14 : vector<1x19x16xbf16> to vector<19x16xbf16>
    %16 = vector.extract_strided_slice %15 {offsets = [0, 0], sizes = [16, 16], strides = [1, 1]} : vector<19x16xbf16> to vector<16x16xbf16>
    %17 = vector.extract_strided_slice %15 {offsets = [1, 0], sizes = [16, 16], strides = [1, 1]} : vector<19x16xbf16> to vector<16x16xbf16>
    %18 = vector.extract_strided_slice %15 {offsets = [2, 0], sizes = [16, 16], strides = [1, 1]} : vector<19x16xbf16> to vector<16x16xbf16>
    %19 = vector.extract_strided_slice %15 {offsets = [3, 0], sizes = [16, 16], strides = [1, 1]} : vector<19x16xbf16> to vector<16x16xbf16>
    %20 = tpu.concatenate %16, %17, %18, %19 in 1 : vector<16x16xbf16>, vector<16x16xbf16>, vector<16x16xbf16>, vector<16x16xbf16> -> vector<16x64xbf16>
    %c3 = arith.constant 3 : index
    %c0_6 = arith.constant 0 : index
    %c0_7 = arith.constant 0 : index
    %21 = vector.load %arg1[%c3, %c0_6, %c0_7] : memref<8x19x16xbf16, #tpu.memory_space<vmem>>, vector<1x19x16xbf16>
    %22 = vector.shape_cast %21 : vector<1x19x16xbf16> to vector<19x16xbf16>
    %23 = vector.extract_strided_slice %22 {offsets = [0, 0], sizes = [16, 16], strides = [1, 1]} : vector<19x16xbf16> to vector<16x16xbf16>
    %24 = vector.extract_strided_slice %22 {offsets = [1, 0], sizes = [16, 16], strides = [1, 1]} : vector<19x16xbf16> to vector<16x16xbf16>
    %25 = vector.extract_strided_slice %22 {offsets = [2, 0], sizes = [16, 16], strides = [1, 1]} : vector<19x16xbf16> to vector<16x16xbf16>
    %26 = vector.extract_strided_slice %22 {offsets = [3, 0], sizes = [16, 16], strides = [1, 1]} : vector<19x16xbf16> to vector<16x16xbf16>
    %27 = tpu.concatenate %23, %24, %25, %26 in 1 : vector<16x16xbf16>, vector<16x16xbf16>, vector<16x16xbf16>, vector<16x16xbf16> -> vector<16x64xbf16>
    %c4 = arith.constant 4 : index
    %c0_8 = arith.constant 0 : index
    %c0_9 = arith.constant 0 : index
    %28 = vector.load %arg1[%c4, %c0_8, %c0_9] : memref<8x19x16xbf16, #tpu.memory_space<vmem>>, vector<1x19x16xbf16>
    %29 = vector.shape_cast %28 : vector<1x19x16xbf16> to vector<19x16xbf16>
    %30 = vector.extract_strided_slice %29 {offsets = [0, 0], sizes = [16, 16], strides = [1, 1]} : vector<19x16xbf16> to vector<16x16xbf16>
    %31 = vector.extract_strided_slice %29 {offsets = [1, 0], sizes = [16, 16], strides = [1, 1]} : vector<19x16xbf16> to vector<16x16xbf16>
    %32 = vector.extract_strided_slice %29 {offsets = [2, 0], sizes = [16, 16], strides = [1, 1]} : vector<19x16xbf16> to vector<16x16xbf16>
    %33 = vector.extract_strided_slice %29 {offsets = [3, 0], sizes = [16, 16], strides = [1, 1]} : vector<19x16xbf16> to vector<16x16xbf16>
    %34 = tpu.concatenate %30, %31, %32, %33 in 1 : vector<16x16xbf16>, vector<16x16xbf16>, vector<16x16xbf16>, vector<16x16xbf16> -> vector<16x64xbf16>
    %c5 = arith.constant 5 : index
    %c0_10 = arith.constant 0 : index
    %c0_11 = arith.constant 0 : index
    %35 = vector.load %arg1[%c5, %c0_10, %c0_11] : memref<8x19x16xbf16, #tpu.memory_space<vmem>>, vector<1x19x16xbf16>
    %36 = vector.shape_cast %35 : vector<1x19x16xbf16> to vector<19x16xbf16>
    %37 = vector.extract_strided_slice %36 {offsets = [0, 0], sizes = [16, 16], strides = [1, 1]} : vector<19x16xbf16> to vector<16x16xbf16>
    %38 = vector.extract_strided_slice %36 {offsets = [1, 0], sizes = [16, 16], strides = [1, 1]} : vector<19x16xbf16> to vector<16x16xbf16>
    %39 = vector.extract_strided_slice %36 {offsets = [2, 0], sizes = [16, 16], strides = [1, 1]} : vector<19x16xbf16> to vector<16x16xbf16>
    %40 = vector.extract_strided_slice %36 {offsets = [3, 0], sizes = [16, 16], strides = [1, 1]} : vector<19x16xbf16> to vector<16x16xbf16>
    %41 = tpu.concatenate %37, %38, %39, %40 in 1 : vector<16x16xbf16>, vector<16x16xbf16>, vector<16x16xbf16>, vector<16x16xbf16> -> vector<16x64xbf16>
    %c6 = arith.constant 6 : index
    %c0_12 = arith.constant 0 : index
    %c0_13 = arith.constant 0 : index
    %42 = vector.load %arg1[%c6, %c0_12, %c0_13] : memref<8x19x16xbf16, #tpu.memory_space<vmem>>, vector<1x19x16xbf16>
    %43 = vector.shape_cast %42 : vector<1x19x16xbf16> to vector<19x16xbf16>
    %44 = vector.extract_strided_slice %43 {offsets = [0, 0], sizes = [16, 16], strides = [1, 1]} : vector<19x16xbf16> to vector<16x16xbf16>
    %45 = vector.extract_strided_slice %43 {offsets = [1, 0], sizes = [16, 16], strides = [1, 1]} : vector<19x16xbf16> to vector<16x16xbf16>
    %46 = vector.extract_strided_slice %43 {offsets = [2, 0], sizes = [16, 16], strides = [1, 1]} : vector<19x16xbf16> to vector<16x16xbf16>
    %47 = vector.extract_strided_slice %43 {offsets = [3, 0], sizes = [16, 16], strides = [1, 1]} : vector<19x16xbf16> to vector<16x16xbf16>
    %48 = tpu.concatenate %44, %45, %46, %47 in 1 : vector<16x16xbf16>, vector<16x16xbf16>, vector<16x16xbf16>, vector<16x16xbf16> -> vector<16x64xbf16>
    %c7 = arith.constant 7 : index
    %c0_14 = arith.constant 0 : index
    %c0_15 = arith.constant 0 : index
    %49 = vector.load %arg1[%c7, %c0_14, %c0_15] : memref<8x19x16xbf16, #tpu.memory_space<vmem>>, vector<1x19x16xbf16>
    %50 = vector.shape_cast %49 : vector<1x19x16xbf16> to vector<19x16xbf16>
    %51 = vector.extract_strided_slice %50 {offsets = [0, 0], sizes = [16, 16], strides = [1, 1]} : vector<19x16xbf16> to vector<16x16xbf16>
    %52 = vector.extract_strided_slice %50 {offsets = [1, 0], sizes = [16, 16], strides = [1, 1]} : vector<19x16xbf16> to vector<16x16xbf16>
    %53 = vector.extract_strided_slice %50 {offsets = [2, 0], sizes = [16, 16], strides = [1, 1]} : vector<19x16xbf16> to vector<16x16xbf16>
    %54 = vector.extract_strided_slice %50 {offsets = [3, 0], sizes = [16, 16], strides = [1, 1]} : vector<19x16xbf16> to vector<16x16xbf16>
    %55 = tpu.concatenate %51, %52, %53, %54 in 1 : vector<16x16xbf16>, vector<16x16xbf16>, vector<16x16xbf16>, vector<16x16xbf16> -> vector<16x64xbf16>
    %56 = tpu.concatenate %6, %13, %20, %27, %34, %41, %48, %55 in 0 : vector<16x64xbf16>, vector<16x64xbf16>, vector<16x64xbf16>, vector<16x64xbf16>, vector<16x64xbf16>, vector<16x64xbf16>, vector<16x64xbf16>, vector<16x64xbf16> -> vector<128x64xbf16>
    %c0_16 = arith.constant 0 : index
    %c0_17 = arith.constant 0 : index
    %57 = vector.load %arg2[%c0_16, %c0_17] : memref<64x128xbf16, #tpu.memory_space<vmem>>, vector<64x128xbf16>
    %cst = arith.constant dense<0.000000e+00> : vector<128x128xf32>
    %58 = tpu.matmul %56, %57, %cst {dimension_numbers = #tpu.dot_dimension_numbers<[1], [0], [0], [1], [0, 0, 1, 1], [], []>} : vector<128x64xbf16>, vector<64x128xbf16>, vector<128x128xf32> -> vector<128x128xf32>
    %59 = tpu.iota {dimensions = array<i32: 0>} : vector<16x128xi32>
    %c0_18 = arith.constant 0 : index
    %c0_19 = arith.constant 0 : index
    %60 = vector.load %arg4[%c0_18, %c0_19] : memref<1x128xi32, #tpu.memory_space<vmem>>, vector<1x128xi32>
    %61 = vector.broadcast %60 : vector<1x128xi32> to vector<16x128xi32>
    %62 = arith.cmpi slt, %59, %61 : vector<16x128xi32>
    %63 = vector.extract_strided_slice %58 {offsets = [0, 0], sizes = [16, 128], strides = [1, 1]} : vector<128x128xf32> to vector<16x128xf32>
    %cst_20 = arith.constant 0xFF800000 : f32
    %64 = vector.broadcast %cst_20 : f32 to vector<16x128xf32>
    %65 = arith.select %62, %63, %64 : vector<16x128xi1>, vector<16x128xf32>
    %cst_21 = arith.constant dense<0xFF800000> : vector<128xf32>
    %66 = vector.multi_reduction <maximumf>, %65, %cst_21 [0] : vector<16x128xf32> to vector<128xf32>
    %67 = vector.shape_cast %66 : vector<128xf32> to vector<1x128xf32>
    %68 = vector.extract_strided_slice %58 {offsets = [16, 0], sizes = [16, 128], strides = [1, 1]} : vector<128x128xf32> to vector<16x128xf32>
    %cst_22 = arith.constant 0xFF800000 : f32
    %69 = vector.broadcast %cst_22 : f32 to vector<16x128xf32>
    %70 = arith.select %62, %68, %69 : vector<16x128xi1>, vector<16x128xf32>
    %cst_23 = arith.constant dense<0xFF800000> : vector<128xf32>
    %71 = vector.multi_reduction <maximumf>, %70, %cst_23 [0] : vector<16x128xf32> to vector<128xf32>
    %72 = vector.shape_cast %71 : vector<128xf32> to vector<1x128xf32>
    %73 = vector.extract_strided_slice %58 {offsets = [32, 0], sizes = [16, 128], strides = [1, 1]} : vector<128x128xf32> to vector<16x128xf32>
    %cst_24 = arith.constant 0xFF800000 : f32
    %74 = vector.broadcast %cst_24 : f32 to vector<16x128xf32>
    %75 = arith.select %62, %73, %74 : vector<16x128xi1>, vector<16x128xf32>
    %cst_25 = arith.constant dense<0xFF800000> : vector<128xf32>
    %76 = vector.multi_reduction <maximumf>, %75, %cst_25 [0] : vector<16x128xf32> to vector<128xf32>
    %77 = vector.shape_cast %76 : vector<128xf32> to vector<1x128xf32>
    %78 = vector.extract_strided_slice %58 {offsets = [48, 0], sizes = [16, 128], strides = [1, 1]} : vector<128x128xf32> to vector<16x128xf32>
    %cst_26 = arith.constant 0xFF800000 : f32
    %79 = vector.broadcast %cst_26 : f32 to vector<16x128xf32>
    %80 = arith.select %62, %78, %79 : vector<16x128xi1>, vector<16x128xf32>
    %cst_27 = arith.constant dense<0xFF800000> : vector<128xf32>
    %81 = vector.multi_reduction <maximumf>, %80, %cst_27 [0] : vector<16x128xf32> to vector<128xf32>
    %82 = vector.shape_cast %81 : vector<128xf32> to vector<1x128xf32>
    %83 = vector.extract_strided_slice %58 {offsets = [64, 0], sizes = [16, 128], strides = [1, 1]} : vector<128x128xf32> to vector<16x128xf32>
    %cst_28 = arith.constant 0xFF800000 : f32
    %84 = vector.broadcast %cst_28 : f32 to vector<16x128xf32>
    %85 = arith.select %62, %83, %84 : vector<16x128xi1>, vector<16x128xf32>
    %cst_29 = arith.constant dense<0xFF800000> : vector<128xf32>
    %86 = vector.multi_reduction <maximumf>, %85, %cst_29 [0] : vector<16x128xf32> to vector<128xf32>
    %87 = vector.shape_cast %86 : vector<128xf32> to vector<1x128xf32>
    %88 = vector.extract_strided_slice %58 {offsets = [80, 0], sizes = [16, 128], strides = [1, 1]} : vector<128x128xf32> to vector<16x128xf32>
    %cst_30 = arith.constant 0xFF800000 : f32
    %89 = vector.broadcast %cst_30 : f32 to vector<16x128xf32>
    %90 = arith.select %62, %88, %89 : vector<16x128xi1>, vector<16x128xf32>
    %cst_31 = arith.constant dense<0xFF800000> : vector<128xf32>
    %91 = vector.multi_reduction <maximumf>, %90, %cst_31 [0] : vector<16x128xf32> to vector<128xf32>
    %92 = vector.shape_cast %91 : vector<128xf32> to vector<1x128xf32>
    %93 = vector.extract_strided_slice %58 {offsets = [96, 0], sizes = [16, 128], strides = [1, 1]} : vector<128x128xf32> to vector<16x128xf32>
    %cst_32 = arith.constant 0xFF800000 : f32
    %94 = vector.broadcast %cst_32 : f32 to vector<16x128xf32>
    %95 = arith.select %62, %93, %94 : vector<16x128xi1>, vector<16x128xf32>
    %cst_33 = arith.constant dense<0xFF800000> : vector<128xf32>
    %96 = vector.multi_reduction <maximumf>, %95, %cst_33 [0] : vector<16x128xf32> to vector<128xf32>
    %97 = vector.shape_cast %96 : vector<128xf32> to vector<1x128xf32>
    %98 = vector.extract_strided_slice %58 {offsets = [112, 0], sizes = [16, 128], strides = [1, 1]} : vector<128x128xf32> to vector<16x128xf32>
    %cst_34 = arith.constant 0xFF800000 : f32
    %99 = vector.broadcast %cst_34 : f32 to vector<16x128xf32>
    %100 = arith.select %62, %98, %99 : vector<16x128xi1>, vector<16x128xf32>
    %cst_35 = arith.constant dense<0xFF800000> : vector<128xf32>
    %101 = vector.multi_reduction <maximumf>, %100, %cst_35 [0] : vector<16x128xf32> to vector<128xf32>
    %102 = vector.shape_cast %101 : vector<128xf32> to vector<1x128xf32>
    %103 = tpu.concatenate %67, %72, %77, %82, %87, %92, %97, %102 in 0 : vector<1x128xf32>, vector<1x128xf32>, vector<1x128xf32>, vector<1x128xf32>, vector<1x128xf32>, vector<1x128xf32>, vector<1x128xf32>, vector<1x128xf32> -> vector<8x128xf32>
    %c0_36 = arith.constant 0 : index
    %c0_37 = arith.constant 0 : index
    %104 = vector.load %arg3[%c0_36, %c0_37] : memref<1x128xf32, #tpu.memory_space<vmem>>, vector<1x128xf32>
    %105 = vector.broadcast %104 : vector<1x128xf32> to vector<8x128xf32>
    %106 = arith.addf %103, %105 : vector<8x128xf32>
    %cst_38 = arith.constant 0.000000e+00 : f32
    %107 = vector.broadcast %cst_38 : f32 to vector<8x128xf32>
    %108 = arith.maximumf %106, %107 : vector<8x128xf32>
    %109 = arith.truncf %108 : vector<8x128xf32> to vector<8x128xbf16>
    %c0_39 = arith.constant 0 : index
    %c0_40 = arith.constant 0 : index
    %110 = vector.load %arg5[%c0_39, %c0_40] : memref<128x128xbf16, #tpu.memory_space<vmem>>, vector<128x128xbf16>
    %cst_41 = arith.constant dense<0.000000e+00> : vector<8x128xf32>
    %111 = tpu.matmul %109, %110, %cst_41 {dimension_numbers = #tpu.dot_dimension_numbers<[1], [0], [0], [1], [0, 0, 1, 1], [], []>} : vector<8x128xbf16>, vector<128x128xbf16>, vector<8x128xf32> -> vector<8x128xf32>
    %c0_42 = arith.constant 0 : index
    %c0_43 = arith.constant 0 : index
    %112 = vector.load %arg6[%c0_42, %c0_43] : memref<1x128xf32, #tpu.memory_space<vmem>>, vector<1x128xf32>
    %113 = vector.broadcast %112 : vector<1x128xf32> to vector<8x128xf32>
    %114 = arith.addf %111, %113 : vector<8x128xf32>
    %c0_44 = arith.constant 0 : index
    %c0_45 = arith.constant 0 : index
    %115 = vector.load %arg7[%c0_44, %c0_45] : memref<8x128xf32, #tpu.memory_space<vmem>>, vector<8x128xf32>
    tpu.vector_store %arg7[%c0_44, %c0_45], %114 {strides = array<i32>} : memref<8x128xf32, #tpu.memory_space<vmem>>, vector<8x128xf32>,
    return
  }
  func.func @transform_0(%arg0: i32) -> (i32, i32, i32) {
    %c0_i32 = arith.constant 0 : i32
    %c0_i32_0 = arith.constant 0 : i32
    %c0_i32_1 = arith.constant 0 : i32
    return %arg0, %c0_i32, %c0_i32_0 : i32, i32, i32
  }
  func.func @transform_1(%arg0: i32) -> (i32, i32) {
    %c0_i32 = arith.constant 0 : i32
    %c0_i32_0 = arith.constant 0 : i32
    %c0_i32_1 = arith.constant 0 : i32
    return %c0_i32, %c0_i32_0 : i32, i32
  }
  func.func @transform_2(%arg0: i32) -> (i32, i32) {
    %c0_i32 = arith.constant 0 : i32
    %c0_i32_0 = arith.constant 0 : i32
    %c0_i32_1 = arith.constant 0 : i32
    return %c0_i32, %c0_i32_0 : i32, i32
  }
  func.func @transform_3(%arg0: i32) -> (i32, i32) {
    %c0_i32 = arith.constant 0 : i32
    %c0_i32_0 = arith.constant 0 : i32
    %c0_i32_1 = arith.constant 0 : i32
    return %c0_i32, %c0_i32_0 : i32, i32
  }
  func.func @transform_4(%arg0: i32) -> (i32, i32) {
    %c0_i32 = arith.constant 0 : i32
    %c0_i32_0 = arith.constant 0 : i32
    %c0_i32_1 = arith.constant 0 : i32
    return %c0_i32, %c0_i32_0 : i32, i32
  }
  func.func @transform_5(%arg0: i32) -> (i32, i32) {
    %c0_i32 = arith.constant 0 : i32
    %c0_i32_0 = arith.constant 0 : i32
    %c0_i32_1 = arith.constant 0 : i32
    return %c0_i32, %c0_i32_0 : i32, i32
  }
  func.func @transform_6(%arg0: i32) -> (i32, i32) {
    %c0_i32 = arith.constant 0 : i32
    %c0_i32_0 = arith.constant 0 : i32
    return %arg0, %c0_i32 : i32, i32
  }
}

</mosaic_0001>

<bundles_post_ra>
// kernel: tpu_custom_call.1
= control target key start
LH: loop header
LB: loop body
LE: loop exit
PB: predicated region body
PF: predicated region fallthrough
CT: control target
= control target key end

     0   :  { %vm51_vm0 = vcmask 1046528   ;;  %vm36_vm1 = vsmask.f32 7424  ;;  %s975_s29 = smov 32   ;;  %vm57_vm2 = vsmask.f32 6400  ;;  %s1300_s0 = inlined_call_operand.vmem [shape: bf16[8,19,16], index: 0, kind: input, shape index: {}]   ;;  %s1301_s1 = inlined_call_operand.vmem [shape: bf16[64,128], index: 1, kind: input, shape index: {}]   ;;  %s1302_s2 = inlined_call_operand.vmem [shape: f32[1,128], index: 2, kind: input, shape index: {}]   ;;  %s1303_s3 = inlined_call_operand.vmem [shape: s32[1,128], index: 3, kind: input, shape index: {}]   ;;  %s1304_s4 = inlined_call_operand.vmem [shape: bf16[128,128], index: 4, kind: input, shape index: {}]   ;;  %s1305_s5 = inlined_call_operand.vmem [shape: f32[1,128], index: 5, kind: input, shape index: {}]   ;;  %s1306_s6 = inlined_call_operand.hbm [shape: f32[8,128], index: 6, kind: output, shape index: {}]  }
   0x1   :  { %v1019_v0 = vld [vmem:[%s1300_s0] sm:$0xff]   ;;  %v924_v1 = vld [vmem:[%s1300_s0 + $0x8] ss:$0 sps:$4 sm:$0x33]   ;;  %v1027_v2 = vld [vmem:[%s1300_s0 + $0xc] sm:$0xff]   ;;  %s976_s10 = smov 16  }
   0x2   :  { %v52_v3 = vrot.slane %v1019_v0, 1  ;;  %v53_v4 = vrot.slane %v924_v1, 1  ;;  %v926_v5 = vld [vmem:[%s1300_s0 + $0x14] ss:$0 sps:$4 sm:$0x33]   ;;  %v91_v6 = vshrl.u32 %v1027_v2, 16 }
   0x3   :  { %v93_v7 = vshll.u32 %v1027_v2, 16  ;;  %v104_v8 = vrot.slane %v1027_v2, 1  ;;  %v38_v10 = vshrl.u32 %v1019_v0, 16  ;;  %v40_v11 = vshll.u32 %v1019_v0, 16  ;;  %v1043_v16 = vld [vmem:[%s1300_s0 + $0x18] sm:$0xff]   ;;  %v1057_v38 = vld [vmem:[%s1300_s0 + $0x24] sm:$0xff]  }
   0x4   :  { %v54_v9 = vsel %vm51_vm0, %v52_v3, %v53_v4  ;;  %v45_v12 = vshll.u32 %v924_v1, 16  ;;  %v98_v14 = vshll.u32 %v926_v5, 16  ;;  %v105_v15 = vrot.slane %v926_v5, 1  ;;  %v928_v29 = vld [vmem:[%s1300_s0 + $0x20] ss:$0 sps:$4 sm:$0x33]  }
   0x5   :  { %55 = vrot.lane.b32.xlu0 %v54_v9, %s975_s29  ;;  %v95_v13 = vrot.slane %v93_v7, 1  ;;  %v58_v17 = vrot.slane %v38_v10, 1  ;;  %v59_v18 = vrot.slane %v40_v11, 2  ;;  %v61_v19 = vshrl.u32 %v924_v1, 16  ;;  %s977_s15 = smov 48   ;;  %v1072_v55 = vld [vmem:[%s1300_s0 + $0x30] sm:$0xff]  }
   0x6   :  { %v64_v20 = vrot.slane %v45_v12, 2  ;;  %v100_v22 = vrot.slane %v98_v14, 1  ;;  %v106_v23 = vsel %vm51_vm0, %v104_v8, %v105_v15  ;;  %v42_v24 = vrot.slane %v40_v11, 1  ;;  %v930_v43 = vld [vmem:[%s1300_s0 + $0x2c] ss:$0 sps:$4 sm:$0x33]  }
   0x7   :  { %v96_v21 = vor.u32 %v95_v13, %v91_v6  ;;  %v60_v25 = vor.u32 %v59_v18, %v58_v17  ;;  %v63_v26 = vrot.slane %v61_v19, 1  ;;  %v47_v27 = vrot.slane %v45_v12, 1  ;;  %v1077_v56 = vld [vmem:[%s1300_s0 + $0x38] ss:$0 sps:$4 sm:$0x33]   ;;  %v939_v61 = vld [vmem:[%s1301_s1] sm:$0xff]  }
   0x8   :  { %v109_v28 = vrot.slane %v91_v6, 1  ;;  %v43_v31 = vor.u32 %v42_v24, %v38_v10  ;;  %v110_v32 = vrot.slane %v93_v7, 2  ;;  %v112_v33 = vshrl.u32 %v926_v5, 16  ;;  %v940_v4 = vld [vmem:[%s1301_s1 + $0x8] sm:$0xff]   ;;  %873 = vmatprep.subr.bf16.mxu0 %v939_v61  ;;  %v1093_v12 = vld [vmem:[%s1300_s0 + $0x3c] sm:$0xff]  }
   0x9   :  { %v101_v30 = vsel %vm36_vm1, %v96_v21, %v100_v22  ;;  %107 = vrot.lane.b32.xlu0 %v106_v23, %s975_s29  ;;  %v65_v34 = vor.u32 %v64_v20, %v63_v26  ;;  %v115_v35 = vrot.slane %v98_v14, 2  ;;  %v139_v36 = vshrl.u32 %v1043_v16, 16  ;;  %874 = vmatpush3.bf16.msra.mxu0 %v939_v61  ;;  %v1100_v18 = vld [vmem:[%s1300_s0 + $0x44] ss:$0 sps:$4 sm:$0x33]  }
   0xa   :  { %102 = vrot.lane.b32.xlu1 %v101_v30, %s976_s10  ;;  %v141_v37 = vshll.u32 %v1043_v16, 16  ;;  %v48_v39 = vsel %vm36_vm1, %v43_v31, %v47_v27  ;;  %v111_v40 = vor.u32 %v110_v32, %v109_v28  ;;  %v114_v41 = vrot.slane %v112_v33, 1  ;;  %875 = vmatprep.subr.bf16.mxu0 %v940_v4  ;;  %v941_v27 = vld [vmem:[%s1301_s1 + $0x10] sm:$0xff]  }
   0xb   :  { %v146_v42 = vshll.u32 %v928_v29, 16  ;;  %v66_v44 = vsel %vm57_vm2, %v60_v25, %v65_v34  ;;  %v152_v46 = vrot.slane %v1043_v16, 1  ;;  %v187_v49 = vshrl.u32 %v1057_v38, 16 }
   0xc   :  { %v143_v45 = vrot.slane %v141_v37, 1  ;;  %v116_v47 = vor.u32 %v115_v35, %v114_v41  ;;  %v189_v50 = vshll.u32 %v1057_v38, 16  ;;  %v153_v52 = vrot.slane %v928_v29, 1 }
   0xd   :  { %49 = vrot.lane.b32.xlu0 %v48_v39, %s976_s10  ;;  %v148_v48 = vrot.slane %v146_v42, 1  ;;  %v194_v53 = vshll.u32 %v930_v43, 16  ;;  %v157_v54 = vrot.slane %v139_v36, 1  ;;  %v158_v59 = vrot.slane %v141_v37, 2  ;;  %876 = vmatpush3.bf16.msra.mxu0 %v940_v4 }
   0xe   :  { %67 = vrot.lane.b32.xlu1 %v66_v44, %s977_s15  ;;  %v144_v51 = vor.u32 %v143_v45, %v139_v36  ;;  %v117_v57 = vsel %vm57_vm2, %v111_v40, %v116_v47  ;;  %v191_v58 = vrot.slane %v189_v50, 1  ;;  %v160_v60 = vshrl.u32 %v928_v29, 16  ;;  %877 = vmatprep.subr.bf16.mxu0 %v941_v27  ;;  %v942_v36 = vld [vmem:[%s1301_s1 + $0x18] sm:$0xff]  }
   0xf   :  { %v196_v63 = vrot.slane %v194_v53, 1  ;;  %v163_v1 = vrot.slane %v146_v42, 2  ;;  %v200_v3 = vrot.slane %v1057_v38, 1  ;;  %v159_v6 = vor.u32 %v158_v59, %v157_v54  ;;  %v1125_v42 = vld [vmem:[%s1300_s0 + $0x48] sm:$0xff]  }
  0x10   :  { %v149_v62 = vsel %vm36_vm1, %v144_v51, %v148_v48  ;;  %v192_v5 = vor.u32 %v191_v58, %v187_v49  ;;  %v162_v7 = vrot.slane %v160_v60, 1  ;;  %v201_v8 = vrot.slane %v930_v43, 1  ;;  %v1137_v51 = vld [vmem:[%s1300_s0 + $0x54] sm:$0xff]  }
  0x11   :  { %150 = vrot.lane.b32.xlu0 %v149_v62, %s976_s10  ;;  %v205_v9 = vrot.slane %v187_v49, 1  ;;  %v206_v10 = vrot.slane %v189_v50, 2  ;;  %v208_v11 = vshrl.u32 %v930_v43, 16  ;;  %v154_v13 = vsel %vm51_vm0, %v152_v46, %v153_v52  ;;  %v936_v43 = vld [vmem:[%s1300_s0 + $0x50] ss:$0 sps:$4 sm:$0x33]   ;;  %878 = vmatpush3.bf16.msra.mxu0 %v941_v27 }
  0x12   :  { %118 = vrot.lane.b32.xlu1 %v117_v57, %s977_s15  ;;  %v197_v14 = vsel %vm36_vm1, %v192_v5, %v196_v63  ;;  %v164_v15 = vor.u32 %v163_v1, %v162_v7  ;;  %v211_v17 = vrot.slane %v194_v53, 2  ;;  %v235_v20 = vshrl.u32 %v1072_v55, 16  ;;  %879 = vmatprep.subr.bf16.mxu0 %v942_v36 }
  0x13   :  { %v210_v19 = vrot.slane %v208_v11, 1  ;;  %v237_v21 = vshll.u32 %v1072_v55, 16  ;;  %v242_v22 = vshll.u32 %v1077_v56, 16  ;;  %v202_v24 = vsel %vm51_vm0, %v200_v3, %v201_v8 }
  0x14   :  { %v165_v23 = vsel %vm57_vm2, %v159_v6, %v164_v15  ;;  %v207_v25 = vor.u32 %v206_v10, %v205_v9  ;;  %v248_v26 = vrot.slane %v1072_v55, 1  ;;  %v283_v30 = vshrl.u32 %v1093_v12, 16 }
  0x15   :  { %198 = vrot.lane.b32.xlu0 %v197_v14, %s976_s10  ;;  %v239_v28 = vrot.slane %v237_v21, 1  ;;  %v244_v29 = vrot.slane %v242_v22, 1  ;;  %v285_v31 = vshll.u32 %v1093_v12, 16  ;;  %v212_v32 = vor.u32 %v211_v17, %v210_v19  ;;  %880 = vmatpush3.bf16.msra.mxu0 %v942_v36 }
  0x16   :  { %155 = vrot.lane.b32.xlu1 %v154_v13, %s975_s29  ;;  %v249_v33 = vrot.slane %v1077_v56, 1  ;;  %v290_v34 = vshll.u32 %v1100_v18, 16  ;;  %v253_v35 = vrot.slane %v235_v20, 1  ;;  %v254_v40 = vrot.slane %v237_v21, 2 }
  0x17   :  { %v240_v37 = vor.u32 %v239_v28, %v235_v20  ;;  %v287_v39 = vrot.slane %v285_v31, 1  ;;  %v256_v41 = vshrl.u32 %v1077_v56, 16  ;;  %v213_v47 = vsel %vm57_vm2, %v207_v25, %v212_v32  ;;  %v938_v56 = vld [vmem:[%s1300_s0 + $0x5c] ss:$0 sps:$4 sm:$0x33]  }
  0x18   :  { %v292_v46 = vrot.slane %v290_v34, 1  ;;  %v259_v49 = vrot.slane %v242_v22, 2  ;;  %v304_v50 = vshrl.u32 %v1100_v18, 16  ;;  %v250_v52 = vsel %vm51_vm0, %v248_v26, %v249_v33 }
  0x19   :  { %203 = vrot.lane.b32.xlu0 %v202_v24, %s975_s29  ;;  %v245_v44 = vsel %vm36_vm1, %v240_v37, %v244_v29  ;;  %v288_v45 = vor.u32 %v287_v39, %v283_v30  ;;  %v258_v48 = vrot.slane %v256_v41, 1  ;;  %v255_v53 = vor.u32 %v254_v40, %v253_v35 }
  0x1a   :  { %166 = vrot.lane.b32.xlu1 %v165_v23, %s977_s15  ;;  %v296_v54 = vrot.slane %v1093_v12, 1  ;;  %v297_v57 = vrot.slane %v1100_v18, 1  ;;  %v301_v58 = vrot.slane %v283_v30, 1  ;;  %v302_v59 = vrot.slane %v285_v31, 2 }
  0x1b   :  { %v333_v60 = vshll.u32 %v1125_v42, 16  ;;  %v293_v61 = vsel %vm36_vm1, %v288_v45, %v292_v46  ;;  %v307_v62 = vrot.slane %v290_v34, 2  ;;  %v331_v63 = vshrl.u32 %v1125_v42, 16 }
  0x1c   :  { %v338_v1 = vshll.u32 %v936_v43, 16  ;;  %v260_v3 = vor.u32 %v259_v49, %v258_v48  ;;  %v306_v4 = vrot.slane %v304_v50, 1  ;;  %v381_v6 = vshll.u32 %v1137_v51, 16 }
  0x1d   :  { %246 = vrot.lane.b32.xlu0 %v245_v44, %s976_s10  ;;  %v335_v5 = vrot.slane %v333_v60, 1  ;;  %v298_v7 = vsel %vm51_vm0, %v296_v54, %v297_v57  ;;  %v379_v8 = vshrl.u32 %v1137_v51, 16  ;;  %v386_v13 = vshll.u32 %v938_v56, 16 }
  0x1e   :  { %214 = vrot.lane.b32.xlu1 %v213_v47, %s977_s15  ;;  %v340_v10 = vrot.slane %v338_v1, 1  ;;  %v383_v11 = vrot.slane %v381_v6, 1  ;;  %v261_v14 = vsel %vm57_vm2, %v255_v53, %v260_v3  ;;  %v303_v15 = vor.u32 %v302_v59, %v301_v58 }
  0x1f   :  { %v336_v9 = vor.u32 %v335_v5, %v331_v63  ;;  %v308_v17 = vor.u32 %v307_v62, %v306_v4  ;;  %v352_v18 = vshrl.u32 %v936_v43, 16  ;;  %v344_v19 = vrot.slane %v1125_v42, 1 }
  0x20   :  { %v345_v20 = vrot.slane %v936_v43, 1  ;;  %v349_v21 = vrot.slane %v331_v63, 1  ;;  %v350_v22 = vrot.slane %v333_v60, 2  ;;  %v384_v24 = vor.u32 %v383_v11, %v379_v8 }
  0x21   :  { %294 = vrot.lane.b32.xlu0 %v293_v61, %s976_s10  ;;  %v341_v23 = vsel %vm36_vm1, %v336_v9, %v340_v10  ;;  %v388_v25 = vrot.slane %v386_v13, 1  ;;  %v355_v26 = vrot.slane %v338_v1, 2  ;;  %v309_v27 = vsel %vm57_vm2, %v303_v15, %v308_v17 }
  0x22   :  { %251 = vrot.lane.b32.xlu1 %v250_v52, %s975_s29  ;;  %v354_v28 = vrot.slane %v352_v18, 1  ;;  %v400_v29 = vshrl.u32 %v938_v56, 16  ;;  %v346_v30 = vsel %vm51_vm0, %v344_v19, %v345_v20  ;;  %v351_v31 = vor.u32 %v350_v22, %v349_v21 }
  0x25   :  { %299 = vrot.lane.b32.xlu0 %v298_v7, %s975_s29 }
  0x26   :  { %262 = vrot.lane.b32.xlu1 %v261_v14, %s977_s15 }
  0x29   :  { %342 = vrot.lane.b32.xlu0 %v341_v23, %s976_s10 }
  0x2a   :  { %11 = vsyncpa [#allocation3], 0  ;;  %310 = vrot.lane.b32.xlu1 %v309_v27, %s977_s15  ;;  %v389_v32 = vsel %vm36_vm1, %v384_v24, %v388_v25  ;;  %v392_v33 = vrot.slane %v1137_v51, 1  ;;  %v393_v34 = vrot.slane %v938_v56, 1  ;;  %v397_v35 = vrot.slane %v379_v8, 1  ;;  %s980_s12 = smov [#allocation2]  }
  0x2b   :  { %v356_v36 = vor.u32 %v355_v26, %v354_v28  ;;  %v398_v37 = vrot.slane %v381_v6, 2  ;;  %v402_v39 = vrot.slane %v400_v29, 1  ;;  %v403_v40 = vrot.slane %v386_v13, 2  ;;  %s784_s13 = sshll.u32 %s980_s12, 4  ;;  %s785_s13 = int_to_ptr.vmem [resolvable:$true] %s784_s13 }
  0x2c   :  { %v394_v41 = vsel %vm51_vm0, %v392_v33, %v393_v34  ;;  %vm69_vm3 = vcmask 130048   ;;  %vm75_vm4 = vcmask 392192   ;;  %vm72_vm5 = vcmask 261120   ;;  %v946_v33 = vld [vmem:[%s1304_s4 + $0x18] sm:$0xff]   ;;  %v947_v34 = vld [vmem:[%s1304_s4 + $0x20] sm:$0xff]   ;;  %p956_p1 = scmp.lt.s32.totalorder %s785_s13, %s785_s13 }
  0x2d   :  { %390 = vrot.lane.b32.xlu0 %v389_v32, %s976_s10  ;;  %v357_v43 = vsel %vm57_vm2, %v351_v31, %v356_v36  ;;  %v399_v44 = vor.u32 %v398_v37, %v397_v35  ;;  %v404_v45 = vor.u32 %v403_v40, %v402_v39  ;;  %vm446_vm6 = vcmask 523264   ;;  %v945_v32 = vld [vmem:[%s1304_s4 + $0x10] sm:$0xff]   ;;  %v948_v35 = vld [vmem:[%s1304_s4 + $0x28] sm:$0xff]   ;;  %v950_v37 = vld [vmem:[%s1304_s4 + $0x38] sm:$0xff]  }
  0x2e   :  { %347 = vrot.lane.b32.xlu1 %v346_v30, %s975_s29  ;;  %v978_v31 = vmov 0.0   ;;  %v949_v36 = vld [vmem:[%s1304_s4 + $0x30] sm:$0xff]   ;;  %vm979_vm7 = vmmov 0   ;;  %v560_v39 = vlaneseq  ;;  %vm642_vm10 = vcmask 1040384  }
  0x2f   :  { %v405_v46 = vsel %vm57_vm2, %v399_v44, %v404_v45  ;;  %897 = vmatprep.subr.bf16.mxu1 %v978_v31  ;;  %913 = vmatprep.mubr.msk.bf16.mxu1 %vm979_vm7, %v978_v31  ;;  %vm644_vm11 = vcmask 1041408   ;;  %vm646_vm12 = vcmask 1042432   ;;  %vm648_vm13 = vcmask 1043456  }
  0x30   :  { %v561_v40 = vshrl.u32 %v560_v39, 7  ;;  %vm650_vm14 = vcmask 1044480   ;;  %vm652_vm15 = vcmask 1045504  }
  0x31   :  { %395 = vrot.lane.b32.xlu0 %v394_v41, %s975_s29 }
  0x32   :  { %358 = vrot.lane.b32.xlu1 %v357_v43, %s977_s15  ;;  %v562_v41 = vadd.s32 8, %v561_v40  ;;  %v841_v43 = vld [vmem:[%s1303_s3] ss:$0 sm:$0xff] }
  0x33   :  { %vm1241_vm8 = vcmp.lt.s32.totalorder %v561_v40, %v841_v43 }
  0x34   :  { %vm1245_vm9 = vcmp.lt.s32.totalorder %v562_v41, %v841_v43 }
  0x36   :  { %406 = vrot.lane.b32.xlu1 %v405_v46, %s977_s15 }
  0x77   :  { %v56_v47 = vpop.permute.xlu0 %55 }
  0x7b   :  { %v108_v48 = vpop.permute.xlu0 %107 }
  0x7c   :  { %v103_v49 = vpop.permute.xlu1 %102 }
  0x7d   :  { %v121_v54 = vsel %vm69_vm3, %v1027_v2, %v103_v49 }
  0x7e   :  { %v123_v59 = vsel %vm72_vm5, %v121_v54, %v108_v48 }
  0x7f   :  { %v50_v50 = vpop.permute.xlu0 %49 }
  0x80   :  { %v68_v52 = vpop.permute.xlu1 %67  ;;  %v71_v53 = vsel %vm69_vm3, %v1019_v0, %v50_v50 }
  0x81   :  { %v74_v56 = vsel %vm72_vm5, %v71_v53, %v56_v47 }
  0x82   :  { %v77_v57 = vsel %vm75_vm4, %v74_v56, %v68_v52 }
  0x83   :  { %881 = vmatprep.mubr.msk.bf16.mxu0 %vm446_vm6, %v77_v57  ;;  %v151_v58 = vpop.permute.xlu0 %150 }
  0x84   :  { %v119_v60 = vpop.permute.xlu1 %118  ;;  %v169_v63 = vsel %vm69_vm3, %v1043_v16, %v151_v58 }
  0x85   :  { %v125_v61 = vsel %vm75_vm4, %v123_v59, %v119_v60 }
  0x86   :  { %882 = vmatmul.mubr.msk.bf16.vlgmr.msra.gmra.mrb[0].mxu0 %vm446_vm6, %v125_v61 }
  0x87   :  { %v199_v62 = vpop.permute.xlu0 %198 }
  0x88   :  { %v156_v0 = vpop.permute.xlu1 %155  ;;  %v217_v4 = vsel %vm69_vm3, %v1057_v38, %v199_v62 }
  0x89   :  { %v171_v1 = vsel %vm72_vm5, %v169_v63, %v156_v0 }
  0x8b   :  { %v204_v2 = vpop.permute.xlu0 %203 }
  0x8c   :  { %v167_v3 = vpop.permute.xlu1 %166  ;;  %v219_v7 = vsel %vm72_vm5, %v217_v4, %v204_v2 }
  0x8d   :  { %v173_v5 = vsel %vm75_vm4, %v171_v1, %v167_v3 }
  0x8e   :  { %885 = vmatprep.mubr.msk.bf16.mxu0 %vm446_vm6, %v173_v5 }
  0x8f   :  { %v247_v6 = vpop.permute.xlu0 %246 }
  0x90   :  { %v215_v8 = vpop.permute.xlu1 %214  ;;  %v265_v11 = vsel %vm69_vm3, %v1072_v55, %v247_v6 }
  0x91   :  { %v221_v9 = vsel %vm75_vm4, %v219_v7, %v215_v8 }
  0x92   :  { %886 = vmatmul.mubr.msk.bf16.gmra.mrb[4].mxu0 %vm446_vm6, %v221_v9 }
  0x93   :  { %v295_v16 = vpop.permute.xlu0 %294 }
  0x94   :  { %v252_v10 = vpop.permute.xlu1 %251  ;;  %v313_v15 = vsel %vm69_vm3, %v1093_v12, %v295_v16 }
  0x95   :  { %v267_v38 = vsel %vm72_vm5, %v265_v11, %v252_v10 }
  0x97   :  { %v300_v13 = vpop.permute.xlu0 %299 }
  0x98   :  { %v263_v14 = vpop.permute.xlu1 %262  ;;  %v315_v19 = vsel %vm72_vm5, %v313_v15, %v300_v13 }
  0x99   :  { %v269_v17 = vsel %vm75_vm4, %v267_v38, %v263_v14 }
  0x9a   :  { %889 = vmatprep.mubr.msk.bf16.mxu0 %vm446_vm6, %v269_v17 }
  0x9b   :  { %v343_v18 = vpop.permute.xlu0 %342 }
  0x9c   :  { %v311_v20 = vpop.permute.xlu1 %310  ;;  %v361_v23 = vsel %vm69_vm3, %v1125_v42, %v343_v18  ;;  %v943_v42 = vld [vmem:[%s1304_s4] sm:$0xff]  }
  0x9d   :  { %v317_v21 = vsel %vm75_vm4, %v315_v19, %v311_v20  ;;  %898 = vmatpush3.bf16.msra.mxu1 %v943_v42 }
  0x9e   :  { %890 = vmatmul.mubr.msk.bf16.gmra.mrb[8].mxu0 %vm446_vm6, %v317_v21  ;;  %899 = vmatprep.subr.bf16.mxu1 %v978_v31 }
  0x9f   :  { %v391_v55 = vpop.permute.xlu0 %390 }
  0xa0   :  { %v348_v22 = vpop.permute.xlu1 %347  ;;  %v409_v25 = vsel %vm69_vm3, %v1137_v51, %v391_v55  ;;  %v944_v51 = vld [vmem:[%s1304_s4 + $0x8] sm:$0xff]  }
  0xa1   :  { %v363_v24 = vsel %vm72_vm5, %v361_v23, %v348_v22  ;;  %900 = vmatpush3.bf16.msra.mxu1 %v944_v51 }
  0xa2   :  { %901 = vmatprep.subr.bf16.mxu1 %v978_v31 }
  0xa3   :  { %v396_v27 = vpop.permute.xlu0 %395 }
  0xa4   :  { %v359_v12 = vpop.permute.xlu1 %358  ;;  %v411_v28 = vsel %vm72_vm5, %v409_v25, %v396_v27 }
  0xa5   :  { %v365_v26 = vsel %vm75_vm4, %v363_v24, %v359_v12  ;;  %902 = vmatpush3.bf16.msra.mxu1 %v945_v32 }
  0xa6   :  { %893 = vmatprep.mubr.msk.bf16.mxu0 %vm446_vm6, %v365_v26  ;;  %903 = vmatprep.subr.bf16.mxu1 %v978_v31 }
  0xa8   :  { %v407_v29 = vpop.permute.xlu1 %406 }
  0xa9   :  { %v413_v30 = vsel %vm75_vm4, %v411_v28, %v407_v29  ;;  %904 = vmatpush3.bf16.msra.mxu1 %v946_v33 }
  0xaa   :  { %894 = vmatmul.mubr.msk.bf16.gmra.mrb[12].mxu0 %vm446_vm6, %v413_v30  ;;  %905 = vmatprep.subr.bf16.mxu1 %v978_v31 }
  0xad   :  { %906 = vmatpush3.bf16.msra.mxu1 %v947_v34 }
  0xae   :  { %907 = vmatprep.subr.bf16.mxu1 %v978_v31 }
  0xb1   :  { %908 = vmatpush3.bf16.msra.mxu1 %v948_v35 }
  0xb2   :  { %909 = vmatprep.subr.bf16.mxu1 %v978_v31 }
  0xb5   :  { %910 = vmatpush3.bf16.msra.mxu1 %v949_v36 }
  0xb6   :  { %911 = vmatprep.subr.bf16.mxu1 %v978_v31 }
  0xb9   :  { %912 = vmatpush3.bf16.msra.mxu1 %v950_v37 }
 0x159   :  { %v883_v44 = vpop.f32.mrb[0].mxu0 }
 0x15a   :  { %v497_v47 = vpop.f32.mrb[1].mxu0  ;;  %v579_v49 = vsel %vm1241_vm8, %v883_v44, -inf }
 0x15b   :  { %v884_v48 = vpop.f32.mrb[2].mxu0  ;;  %v570_v53 = vsel %vm1241_vm8, %v497_v47, -inf }
 0x15c   :  { %v580_v50 = vsel %vm1245_vm9, %v884_v48, -inf  ;;  %v500_v52 = vpop.f32.mrb[3].mxu0 }
 0x15d   :  { %v581_v54 = vmax.f32 %v579_v49, %v580_v50  ;;  %v571_v56 = vsel %vm1245_vm9, %v500_v52, -inf }
 0x15e   :  { %v572_v57 = vmax.f32 %v570_v53, %v571_v56 }
 0x15f   :  { %v582_v58 = vrot.slane %v581_v54, 4 }
 0x160   :  { %v573_v59 = vrot.slane %v572_v57, 4 }
 0x161   :  { %v583_v60 = vmax.f32 %v581_v54, %v582_v58 }
 0x162   :  { %v574_v61 = vmax.f32 %v572_v57, %v573_v59 }
 0x163   :  { %v584_v62 = vrot.slane %v583_v60, 2 }
 0x164   :  { %v575_v0 = vrot.slane %v574_v61, 2 }
 0x165   :  { %v585_v63 = vmax.f32 %v583_v60, %v584_v62  ;;  %v887_v2 = vpop.f32.mrb[4].mxu0 }
 0x166   :  { %v576_v1 = vmax.f32 %v574_v61, %v575_v0  ;;  %v513_v3 = vpop.f32.mrb[5].mxu0  ;;  %v597_v7 = vsel %vm1241_vm8, %v887_v2, -inf }
 0x167   :  { %v586_v4 = vrot.slane %v585_v63, 1  ;;  %v888_v5 = vpop.f32.mrb[6].mxu0  ;;  %v588_v10 = vsel %vm1241_vm8, %v513_v3, -inf }
 0x168   :  { %v577_v6 = vrot.slane %v576_v1, 1  ;;  %v598_v8 = vsel %vm1245_vm9, %v888_v5, -inf  ;;  %v516_v9 = vpop.f32.mrb[7].mxu0 }
 0x169   :  { %v587_v16 = vmax.f32 %v585_v63, %v586_v4  ;;  %v599_v11 = vmax.f32 %v597_v7, %v598_v8  ;;  %v589_v13 = vsel %vm1245_vm9, %v516_v9, -inf }
 0x16a   :  { %v578_v38 = vmax.f32 %v576_v1, %v577_v6  ;;  %v590_v14 = vmax.f32 %v588_v10, %v589_v13  ;;  %v842_v13 = vld [vmem:[%s1302_s2] ss:$0 sm:$0xff]  ;;  %s951_s2 = scalar_lea.vmem %s785_s13, 128 }
 0x16b   :  { %v600_v15 = vrot.slane %v599_v11, 4  ;;  %p952_p0 = scmp.ne.s32.totalorder %s785_s13, %s951_s2  ;;  %p957_p2 = scmp.lt.s32.totalorder %s951_s2, %s951_s2 }
 0x16c   :  { %v643_v17 = vsel %vm642_vm10, %v578_v38, %v587_v16  ;;  %v591_v18 = vrot.slane %v590_v14, 4 }
 0x16d   :  { %v601_v19 = vmax.f32 %v599_v11, %v600_v15  ;;  %p958_p3 = por %p957_p2, %p956_p1 }
 0x16e   :  { %v592_v20 = vmax.f32 %v590_v14, %v591_v18 }
 0x16f   :  { %v602_v21 = vrot.slane %v601_v19, 2  ;;  %p959_p4 = pnand %p958_p3, %p952_p0 }
 0x170   :  { %v593_v55 = vrot.slane %v592_v20, 2 }
 0x171   :  { %v603_v22 = vmax.f32 %v601_v19, %v602_v21  ;;  %v891_v23 = vpop.f32.mrb[8].mxu0  ;;  %v843_v19 = vld [vmem:[%s1305_s5] ss:$0 sm:$0xff] }
 0x172   :  { %v594_v24 = vmax.f32 %v592_v20, %v593_v55  ;;  %v529_v12 = vpop.f32.mrb[9].mxu0  ;;  %v615_v28 = vsel %vm1241_vm8, %v891_v23, -inf }
 0x173   :  { %v604_v25 = vrot.slane %v603_v22, 1  ;;  %v892_v26 = vpop.f32.mrb[10].mxu0  ;;  %v606_v42 = vsel %vm1241_vm8, %v529_v12, -inf }
 0x174   :  { %v595_v27 = vrot.slane %v594_v24, 1  ;;  %v616_v29 = vsel %vm1245_vm9, %v892_v26, -inf  ;;  %v532_v30 = vpop.f32.mrb[11].mxu0 }
 0x175   :  { %v617_v31 = vmax.f32 %v615_v28, %v616_v29  ;;  %v607_v51 = vsel %vm1245_vm9, %v532_v30, -inf  ;;  %v605_v34 = vmax.f32 %v603_v22, %v604_v25 }
 0x176   :  { %v596_v32 = vmax.f32 %v594_v24, %v595_v27  ;;  %v608_v33 = vmax.f32 %v606_v42, %v607_v51 }
 0x177   :  { %v618_v35 = vrot.slane %v617_v31, 4 }
 0x178   :  { %v645_v36 = vsel %vm644_vm11, %v643_v17, %v596_v32  ;;  %v609_v37 = vrot.slane %v608_v33, 4 }
 0x179   :  { %v619_v39 = vmax.f32 %v617_v31, %v618_v35  ;;  %v647_v40 = vsel %vm646_vm12, %v645_v36, %v605_v34 }
 0x17a   :  { %v610_v41 = vmax.f32 %v608_v33, %v609_v37 }
 0x17b   :  { %v620_v43 = vrot.slane %v619_v39, 2 }
 0x17c   :  { %v611_v44 = vrot.slane %v610_v41, 2 }
 0x17d   :  { %v621_v47 = vmax.f32 %v619_v39, %v620_v43  ;;  %v895_v48 = vpop.f32.mrb[12].mxu0 }
 0x17e   :  { %v612_v49 = vmax.f32 %v610_v41, %v611_v44  ;;  %v545_v50 = vpop.f32.mrb[13].mxu0  ;;  %v633_v56 = vsel %vm1241_vm8, %v895_v48, -inf }
 0x17f   :  { %v622_v52 = vrot.slane %v621_v47, 1  ;;  %v896_v53 = vpop.f32.mrb[14].mxu0  ;;  %v624_v59 = vsel %vm1241_vm8, %v545_v50, -inf }
 0x180   :  { %v613_v54 = vrot.slane %v612_v49, 1  ;;  %v634_v57 = vsel %vm1245_vm9, %v896_v53, -inf  ;;  %v548_v58 = vpop.f32.mrb[15].mxu0 }
 0x181   :  { %v635_v60 = vmax.f32 %v633_v56, %v634_v57  ;;  %v625_v61 = vsel %vm1245_vm9, %v548_v58, -inf  ;;  %v623_v63 = vmax.f32 %v621_v47, %v622_v52 }
 0x182   :  { %v614_v62 = vmax.f32 %v612_v49, %v613_v54  ;;  %v626_v0 = vmax.f32 %v624_v59, %v625_v61 }
 0x183   :  { %v636_v2 = vrot.slane %v635_v60, 4 }
 0x184   :  { %v649_v1 = vsel %vm648_vm13, %v647_v40, %v614_v62  ;;  %v627_v3 = vrot.slane %v626_v0, 4 }
 0x185   :  { %v637_v4 = vmax.f32 %v635_v60, %v636_v2  ;;  %v651_v5 = vsel %vm650_vm14, %v649_v1, %v623_v63 }
 0x186   :  { %v628_v6 = vmax.f32 %v626_v0, %v627_v3 }
 0x187   :  { %v638_v7 = vrot.slane %v637_v4, 2 }
 0x188   :  { %v629_v8 = vrot.slane %v628_v6, 2 }
 0x189   :  { %v639_v9 = vmax.f32 %v637_v4, %v638_v7 }
 0x18a   :  { %v630_v16 = vmax.f32 %v628_v6, %v629_v8 }
 0x18b   :  { %v640_v45 = vrot.slane %v639_v9, 1 }
 0x18c   :  { %v631_v10 = vrot.slane %v630_v16, 1 }
 0x18d   :  { %v641_v46 = vmax.f32 %v639_v9, %v640_v45 }
 0x18e   :  { %v632_v11 = vmax.f32 %v630_v16, %v631_v10 }
 0x190   :  { %v653_v38 = vsel %vm652_vm15, %v651_v5, %v632_v11 }
 0x191   :  { %v655_v14 = vsel %vm51_vm0, %v653_v38, %v641_v46 }
 0x192   :  { %v663_v15 = vadd.f32 %v842_v13, %v655_v14 }
 0x194   :  { %v664_v17 = vmax.f32 %v663_v15, 0.0 }
 0x196   :  { %v665_v18 = vpack.c.bf16 %v664_v17, %v664_v17 }
 0x198   :  { %914 = vmatmul.mubr.bf16.vlgmr.msra.gmra.mrb[0].mxu1 %v665_v18 }
 0x26b   :  { %v771_v20 = vpop.f32.mrb[0].mxu1 }
 0x26c   :  { %v772_v21 = vadd.f32 %v843_v19, %v771_v20  ;;  %v915_v55 = vpop.f32.mrb[1].mxu1 }
 0x26d   :  { %v774_v22 = vpop.f32.mrb[2].mxu1 }
 0x26e   :  { %777 = vst [vmem:[#allocation2] sm:$0xff] %v772_v21  ;;  %v916_v23 = vpop.f32.mrb[3].mxu1 }
 0x26f   :  { %962 = shalt.err (!%p959_p4)
}
 0x270   :  { %s963_s5 = scalar_lea.hbm %s1306_s6, 128 }
 0x271   :  { %p964_p5 = scmp.ne.s32.totalorder %s1306_s6, %s963_s5  ;;  %p967_p6 = scmp.lt.u32.totalorder %s963_s5, %s1306_s6 }
 0x273   :  { %p969_p7 = pnand %p967_p6, %p964_p5 }
 0x275   :  { %972 = shalt.err (!%p969_p7)
}
 0x276   :  { %787 = dma.vmem_to_hbm [thread:$0]  %s785_s13, 128, %s1306_s6, [#allocation3]  }
 0x277   :  { %973 = dma.done.wait [#allocation3], 128  }
 0x278   :  { %974 = vsyncadd [#allocation3], 4294967168 }
 0x279   :  { %791 = vsyncpa [#allocation3], 1 }

</bundles_post_ra>
